<compile_context>
chip_gen: v7x
topology: tpu7x:2x2x1
jax: 0.10.0
libtpu: 0.0.40
codegen_flags: <defaults>
</compile_context>

<pallas_src>
import functools
import math

import jax
import jax.numpy as jnp
from jax import lax
from jax.experimental import pallas as pl
from jax.experimental.pallas import tpu as pltpu

_LANE = 128
_SUBLANE = 8
_TARGET_TILE_BYTES = 1 << 20  # ~1 MiB per block; x + y double-buffered ≈ 4 MiB VMEM.

# Irwin-Hall(8) over byte-uniforms U{0..255}: mean / std of the raw byte sum.
_IH8_MEAN = 8 * 255.0 / 2.0                         # 1020.0
_IH8_STD = math.sqrt(8 * (256.0 ** 2 - 1) / 12.0)   # ~209.02


def _mix32(x):
    """murmur3 fmix32 finalizer on uint32 (VPU-only integer ops)."""
    x = x ^ (x >> jnp.uint32(16))
    x = x * jnp.uint32(0x85EBCA6B)
    x = x ^ (x >> jnp.uint32(13))
    x = x * jnp.uint32(0xC2B2AE35)
    x = x ^ (x >> jnp.uint32(16))
    return x


def _sum_bytes(h):
    """Sum of the 4 bytes of each uint32 word (each byte ~ U{0..255})."""
    b0 = h & jnp.uint32(0xFF)
    b1 = (h >> jnp.uint32(8)) & jnp.uint32(0xFF)
    b2 = (h >> jnp.uint32(16)) & jnp.uint32(0xFF)
    b3 = h >> jnp.uint32(24)
    # uint32 -> int32 is a no-op reinterpret (values <= 1020), then -> f32.
    return (b0 + b1 + b2 + b3).astype(jnp.int32).astype(jnp.float32)


def _gaussian_noise_kernel(seed_ref, x_ref, o_ref, *, std):
    tr, tc = x_ref.shape
    i = pl.program_id(0)

    # Global flat element index: unique per element and per grid step, so every
    # tile (and each TensorCore under "parallel" semantics) draws independent
    # noise with no PRNG state.  (int32 index: fine for < 2^31 elements.)
    row = lax.broadcasted_iota(jnp.int32, (tr, tc), 0)
    col = lax.broadcasted_iota(jnp.int32, (tr, tc), 1)
    idx = ((i * tr + row) * tc + col).astype(jnp.uint32)

    seed = seed_ref[0].astype(jnp.uint32)

    # Two decorrelated keyed hashes -> 8 uniform bytes per element.
    h1 = _mix32(idx * jnp.uint32(0x9E3779B1) + seed)
    h2 = _mix32(idx * jnp.uint32(0x85EBCA77) + (seed ^ jnp.uint32(0x5BF03635)))
    s = _sum_bytes(h1) + _sum_bytes(h2)

    # Irwin-Hall(8) normalized to ~N(0,1), pre-scaled by std (one fused mul).
    scale = jnp.float32(std / _IH8_STD)
    noise = ((s - jnp.float32(_IH8_MEAN)) * scale).astype(x_ref.dtype)
    o_ref[...] = x_ref[...] + noise


def _pick_columns(n):
    """Widest lane-dense column count that divides n (avoids any padding)."""
    for c in (1024, 512, 256, 128):
        if n % c == 0:
            return c
    return None


def gaussian_noise(x, seed, *, std=0.1, training=True,
                   block_bytes=_TARGET_TILE_BYTES):
    """Pallas equivalent of GaussianNoise.forward.

    x:     any-shaped float array (NCHW for conv activations).
    seed:  python int or int32 scalar; vary it per step for fresh noise.
    """
    if std == 0.0 or not training:
        return x

    orig_shape, orig_dtype = x.shape, x.dtype
    n = x.size
    flat = x.reshape(-1)

    cols = _pick_columns(n)
    padded = 0
    if cols is None:
        # Rare non-multiple-of-128 case: minimal pad + post-slice.
        # TODO(synk): mask the tail of the last tile in-kernel instead to save
        # the extra HBM passes for ragged sizes.
        cols = _LANE
        padded = (-n) % cols
        flat = jnp.pad(flat, (0, padded))
    rows = flat.shape[0] // cols
    x2d = flat.reshape(rows, cols)

    # ~1 MiB tiles on the row axis (multiple of 8 sublanes unless full-extent).
    bytes_per_row = cols * x2d.dtype.itemsize
    tile_rows = min(rows, max(_SUBLANE, block_bytes // bytes_per_row))
    if tile_rows < rows:
        tile_rows = max(_SUBLANE, (tile_rows // _SUBLANE) * _SUBLANE)
    grid = (pl.cdiv(rows, tile_rows),)

    seed_arr = jnp.asarray([seed], dtype=jnp.int32)
    kernel = functools.partial(_gaussian_noise_kernel, std=float(std))

    out2d = pl.pallas_call(
        kernel,
        out_shape=jax.ShapeDtypeStruct((rows, cols), orig_dtype),
        grid_spec=pltpu.PrefetchScalarGridSpec(
            num_scalar_prefetch=1,
            grid=grid,
            in_specs=[pl.BlockSpec((tile_rows, cols), lambda i, seed_ref: (i, 0))],
            out_specs=pl.BlockSpec((tile_rows, cols), lambda i, seed_ref: (i, 0)),
        ),
        compiler_params=pltpu.CompilerParams(
            dimension_semantics=("parallel",),  # shard tiles across v7x's 2 TCs
        ),
    )(seed_arr, x2d)

    out = out2d.reshape(-1)
    if padded:
        out = out[:n]
    return out.reshape(orig_shape)


if __name__ == "__main__":
    key = jax.random.PRNGKey(0)
    std = 0.1

    # Small NCHW activation, consistent with a DCGAN discriminator input.
    x = jax.random.normal(key, (2, 4, 16, 16), dtype=jnp.float32)
    y = jax.block_until_ready(gaussian_noise(x, seed=1234, std=std, training=True))
    assert y.shape == x.shape and y.dtype == x.dtype
    diff = y - x
    assert float(jnp.max(jnp.abs(diff))) > 0.0
    emp_std = float(jnp.std(diff))
    emp_mean = float(jnp.mean(diff))
    assert 0.07 < emp_std < 0.13, f"unexpected noise std {emp_std}"
    assert abs(emp_mean) < 0.02, f"unexpected noise mean {emp_mean}"

    # Different seeds must give different noise.
    y_b = jax.block_until_ready(gaussian_noise(x, seed=999, std=std, training=True))
    assert float(jnp.max(jnp.abs(y_b - y))) > 0.0

    # Multi-tile path (grid > 1): small block_bytes forces several row tiles.
    x_big = jax.random.normal(jax.random.PRNGKey(1), (8, 8, 32, 32), dtype=jnp.float32)
    y_big = jax.block_until_ready(
        gaussian_noise(x_big, seed=7, std=std, training=True, block_bytes=1 << 15))
    d_big = y_big - x_big
    assert y_big.shape == x_big.shape
    assert 0.07 < float(jnp.std(d_big)) < 0.13

    # Ragged (non multiple-of-128) size exercises the pad fallback path.
    x_odd = jax.random.normal(jax.random.PRNGKey(2), (3, 5, 7, 11), dtype=jnp.float32)
    y_odd = jax.block_until_ready(gaussian_noise(x_odd, seed=3, std=std, training=True))
    assert y_odd.shape == x_odd.shape
    assert 0.07 < float(jnp.std(y_odd - x_odd)) < 0.13

    # Eval mode / std == 0 paths must be identity.
    y_eval = jax.block_until_ready(gaussian_noise(x, seed=1234, std=std, training=False))
    assert bool(jnp.all(y_eval == x))
    y_zero = jax.block_until_ready(gaussian_noise(x, seed=1234, std=0.0, training=True))
    assert bool(jnp.all(y_zero == x))

    print("KERNEL_OK")
</pallas_src>

<mosaic_0001>
module attributes {stable_mosaic.version = 11 : i64} {
  func.func @_gaussian_noise_kernel(%arg0: i32, %arg1: memref<1xi32, #tpu.memory_space<smem>>, %arg2: memref<2x1024xf32, #tpu.memory_space<vmem>>, %arg3: memref<2x1024xf32, #tpu.memory_space<vmem>>) attributes {dimension_semantics = [#tpu.dimension_semantics<parallel>], iteration_bounds = array<i64: 1>, scalar_prefetch = 1 : i64, scratch_operands = 0 : i64, tpu.core_type = #tpu.core_type<tc>, window_params = [{transform_indices = @transform_0, window_bounds = array<i64: 2, 1024>}, {transform_indices = @transform_1, window_bounds = array<i64: 2, 1024>}]} {
    %0 = tpu.iota {dimensions = array<i32: 0>} : vector<2x1024xi32>
    %1 = tpu.iota {dimensions = array<i32: 1>} : vector<2x1024xi32>
    %c2_i32 = arith.constant 2 : i32
    %2 = arith.muli %arg0, %c2_i32 : i32
    %3 = vector.broadcast %2 : i32 to vector<2x1024xi32>
    %4 = arith.addi %3, %0 : vector<2x1024xi32>
    %c1024_i32 = arith.constant 1024 : i32
    %5 = vector.broadcast %c1024_i32 : i32 to vector<2x1024xi32>
    %6 = arith.muli %4, %5 : vector<2x1024xi32>
    %7 = arith.addi %6, %1 : vector<2x1024xi32>
    %c0 = arith.constant 0 : index
    %8 = memref.load %arg1[%c0] : memref<1xi32, #tpu.memory_space<smem>>
    %c-1640531535_i32 = arith.constant -1640531535 : i32
    %9 = vector.broadcast %c-1640531535_i32 : i32 to vector<2x1024xi32>
    %10 = arith.muli %7, %9 : vector<2x1024xi32>
    %11 = vector.broadcast %8 : i32 to vector<2x1024xi32>
    %12 = arith.addi %10, %11 : vector<2x1024xi32>
    %c16_i32 = arith.constant 16 : i32
    %13 = vector.broadcast %c16_i32 : i32 to vector<2x1024xi32>
    %14 = arith.shrui %12, %13 : vector<2x1024xi32>
    %15 = arith.xori %12, %14 : vector<2x1024xi32>
    %c-2048144789_i32 = arith.constant -2048144789 : i32
    %16 = vector.broadcast %c-2048144789_i32 : i32 to vector<2x1024xi32>
    %17 = arith.muli %15, %16 : vector<2x1024xi32>
    %c13_i32 = arith.constant 13 : i32
    %18 = vector.broadcast %c13_i32 : i32 to vector<2x1024xi32>
    %19 = arith.shrui %17, %18 : vector<2x1024xi32>
    %20 = arith.xori %17, %19 : vector<2x1024xi32>
    %c-1028477387_i32 = arith.constant -1028477387 : i32
    %21 = vector.broadcast %c-1028477387_i32 : i32 to vector<2x1024xi32>
    %22 = arith.muli %20, %21 : vector<2x1024xi32>
    %c16_i32_0 = arith.constant 16 : i32
    %23 = vector.broadcast %c16_i32_0 : i32 to vector<2x1024xi32>
    %24 = arith.shrui %22, %23 : vector<2x1024xi32>
    %25 = arith.xori %22, %24 : vector<2x1024xi32>
    %c-2048144777_i32 = arith.constant -2048144777 : i32
    %26 = vector.broadcast %c-2048144777_i32 : i32 to vector<2x1024xi32>
    %27 = arith.muli %7, %26 : vector<2x1024xi32>
    %c1542469173_i32 = arith.constant 1542469173 : i32
    %28 = arith.xori %8, %c1542469173_i32 : i32
    %29 = vector.broadcast %28 : i32 to vector<2x1024xi32>
    %30 = arith.addi %27, %29 : vector<2x1024xi32>
    %c16_i32_1 = arith.constant 16 : i32
    %31 = vector.broadcast %c16_i32_1 : i32 to vector<2x1024xi32>
    %32 = arith.shrui %30, %31 : vector<2x1024xi32>
    %33 = arith.xori %30, %32 : vector<2x1024xi32>
    %c-2048144789_i32_2 = arith.constant -2048144789 : i32
    %34 = vector.broadcast %c-2048144789_i32_2 : i32 to vector<2x1024xi32>
    %35 = arith.muli %33, %34 : vector<2x1024xi32>
    %c13_i32_3 = arith.constant 13 : i32
    %36 = vector.broadcast %c13_i32_3 : i32 to vector<2x1024xi32>
    %37 = arith.shrui %35, %36 : vector<2x1024xi32>
    %38 = arith.xori %35, %37 : vector<2x1024xi32>
    %c-1028477387_i32_4 = arith.constant -1028477387 : i32
    %39 = vector.broadcast %c-1028477387_i32_4 : i32 to vector<2x1024xi32>
    %40 = arith.muli %38, %39 : vector<2x1024xi32>
    %c16_i32_5 = arith.constant 16 : i32
    %41 = vector.broadcast %c16_i32_5 : i32 to vector<2x1024xi32>
    %42 = arith.shrui %40, %41 : vector<2x1024xi32>
    %43 = arith.xori %40, %42 : vector<2x1024xi32>
    %c255_i32 = arith.constant 255 : i32
    %44 = vector.broadcast %c255_i32 : i32 to vector<2x1024xi32>
    %45 = arith.andi %25, %44 : vector<2x1024xi32>
    %c8_i32 = arith.constant 8 : i32
    %46 = vector.broadcast %c8_i32 : i32 to vector<2x1024xi32>
    %47 = arith.shrui %25, %46 : vector<2x1024xi32>
    %c255_i32_6 = arith.constant 255 : i32
    %48 = vector.broadcast %c255_i32_6 : i32 to vector<2x1024xi32>
    %49 = arith.andi %47, %48 : vector<2x1024xi32>
    %c16_i32_7 = arith.constant 16 : i32
    %50 = vector.broadcast %c16_i32_7 : i32 to vector<2x1024xi32>
    %51 = arith.shrui %25, %50 : vector<2x1024xi32>
    %c255_i32_8 = arith.constant 255 : i32
    %52 = vector.broadcast %c255_i32_8 : i32 to vector<2x1024xi32>
    %53 = arith.andi %51, %52 : vector<2x1024xi32>
    %c24_i32 = arith.constant 24 : i32
    %54 = vector.broadcast %c24_i32 : i32 to vector<2x1024xi32>
    %55 = arith.shrui %25, %54 : vector<2x1024xi32>
    %56 = arith.addi %45, %49 : vector<2x1024xi32>
    %57 = arith.addi %56, %53 : vector<2x1024xi32>
    %58 = arith.addi %57, %55 : vector<2x1024xi32>
    %59 = arith.sitofp %58 : vector<2x1024xi32> to vector<2x1024xf32>
    %c255_i32_9 = arith.constant 255 : i32
    %60 = vector.broadcast %c255_i32_9 : i32 to vector<2x1024xi32>
    %61 = arith.andi %43, %60 : vector<2x1024xi32>
    %c8_i32_10 = arith.constant 8 : i32
    %62 = vector.broadcast %c8_i32_10 : i32 to vector<2x1024xi32>
    %63 = arith.shrui %43, %62 : vector<2x1024xi32>
    %c255_i32_11 = arith.constant 255 : i32
    %64 = vector.broadcast %c255_i32_11 : i32 to vector<2x1024xi32>
    %65 = arith.andi %63, %64 : vector<2x1024xi32>
    %c16_i32_12 = arith.constant 16 : i32
    %66 = vector.broadcast %c16_i32_12 : i32 to vector<2x1024xi32>
    %67 = arith.shrui %43, %66 : vector<2x1024xi32>
    %c255_i32_13 = arith.constant 255 : i32
    %68 = vector.broadcast %c255_i32_13 : i32 to vector<2x1024xi32>
    %69 = arith.andi %67, %68 : vector<2x1024xi32>
    %c24_i32_14 = arith.constant 24 : i32
    %70 = vector.broadcast %c24_i32_14 : i32 to vector<2x1024xi32>
    %71 = arith.shrui %43, %70 : vector<2x1024xi32>
    %72 = arith.addi %61, %65 : vector<2x1024xi32>
    %73 = arith.addi %72, %69 : vector<2x1024xi32>
    %74 = arith.addi %73, %71 : vector<2x1024xi32>
    %75 = arith.sitofp %74 : vector<2x1024xi32> to vector<2x1024xf32>
    %76 = arith.addf %59, %75 : vector<2x1024xf32>
    %cst = arith.constant 1.020000e+03 : f32
    %77 = vector.broadcast %cst : f32 to vector<2x1024xf32>
    %78 = arith.subf %76, %77 : vector<2x1024xf32>
    %cst_15 = arith.constant 4.78419621E-4 : f32
    %79 = vector.broadcast %cst_15 : f32 to vector<2x1024xf32>
    %80 = arith.mulf %78, %79 : vector<2x1024xf32>
    %c0_16 = arith.constant 0 : index
    %c0_17 = arith.constant 0 : index
    %81 = vector.load %arg2[%c0_16, %c0_17] : memref<2x1024xf32, #tpu.memory_space<vmem>>, vector<2x1024xf32>
    %82 = arith.addf %81, %80 : vector<2x1024xf32>
    %c0_18 = arith.constant 0 : index
    %c0_19 = arith.constant 0 : index
    %83 = vector.load %arg3[%c0_18, %c0_19] : memref<2x1024xf32, #tpu.memory_space<vmem>>, vector<2x1024xf32>
    tpu.vector_store %arg3[%c0_18, %c0_19], %82 {strides = array<i32>} : memref<2x1024xf32, #tpu.memory_space<vmem>>, vector<2x1024xf32>,
    return
  }
  func.func @transform_0(%arg0: i32, %arg1: memref<1xi32, #tpu.memory_space<smem>>) -> (i32, i32) {
    %c0_i32 = arith.constant 0 : i32
    %c0_i32_0 = arith.constant 0 : i32
    return %arg0, %c0_i32 : i32, i32
  }
  func.func @transform_1(%arg0: i32, %arg1: memref<1xi32, #tpu.memory_space<smem>>) -> (i32, i32) {
    %c0_i32 = arith.constant 0 : i32
    %c0_i32_0 = arith.constant 0 : i32
    return %arg0, %c0_i32 : i32, i32
  }
}

</mosaic_0001>

<bundles_post_ra>
// kernel: tpu_custom_call.1
= control target key start
LH: loop header
LB: loop body
LE: loop exit
PB: predicated region body
PF: predicated region fallthrough
CT: control target
= control target key end

     0   :  { %8 = vsyncpa [#allocation5], 0  ;;  %s753_s0 = inlined_call_operand.<no memory space> [shape: s32[1], index: 0, kind: input, shape index: {}]   ;;  %s754_s1 = inlined_call_operand.hbm [shape: f32[2,1024], index: 1, kind: input, shape index: {}]   ;;  %s755_s2 = inlined_call_operand.hbm [shape: f32[2,1024], index: 2, kind: output, shape index: {}]  }
   0x1   :  { %9 = vsyncpa [#allocation6], 0  ;;  %s518_s9 = smov [#allocation4]   ;;  %s470_s13 = scalar_lea.hbm %s754_s1, 256 }
   0x2   :  { %s16_s10 = sshll.u32 %s518_s9, 4  ;;  %p471_p0 = scmp.ne.s32.totalorder %s754_s1, %s470_s13  ;;  %s17_s10 = int_to_ptr.vmem [resolvable:$true] %s16_s10 }
   0x3   :  { %p474_p1 = scmp.lt.u32.totalorder %s470_s13, %s754_s1 }
   0x5   :  { %p476_p2 = pnand %p474_p1, %p471_p0 }
   0x7   :  { %479 = shalt.err (!%p476_p2)
}
   0x8   :  { %s480_s18 = scalar_lea.vmem %s17_s10, 256  ;;  %p485_p4 = scmp.lt.s32.totalorder %s17_s10, %s17_s10 }
   0x9   :  { %p481_p3 = scmp.ne.s32.totalorder %s17_s10, %s480_s18  ;;  %p486_p5 = scmp.lt.s32.totalorder %s480_s18, %s480_s18 }
   0xb   :  { %p487_p6 = por %p486_p5, %p485_p4 }
   0xd   :  { %p488_p7 = pnand %p487_p6, %p481_p3 }
   0xf   :  { %491 = shalt.err (!%p488_p7)
}
  0x10   :  { %19 = dma.hbm_to_vmem [thread:$0]  %s754_s1, 256, %s17_s10, [#allocation5]  }
  0x11   :  { %514 = dma.done.wait [#allocation5], 256  }
  0x12   :  { %515 = vsyncadd [#allocation5], 4294967040  ;;  %v23_v0 = vlaneseq  ;;  %v55_v11 = vstv %s753_s0  ;;  %v519_v12 = vmov 1983009808   ;;  %s136_s24 = sxor.u32 1542469173, %s753_s0 }
  0x13   :  { %v554_v13 = vunpack.c.l.s4 %v519_v12  ;;  %v579_v26 = vstv %s136_s24  ;;  %s520_s0 = smov [#allocation7]  }
  0x14   :  { %v548_v1 = vshrl.u32 %v23_v0, 7  ;;  %v26_v2 = vand.u32 127, %v23_v0  ;;  %s450_s25 = sshll.u32 %s520_s0, 4  ;;  %s451_s25 = int_to_ptr.vmem [resolvable:$true] %s450_s25 }
  0x15   :  { %s492_s26 = scalar_lea.vmem %s451_s25, 256  ;;  %p497_p9 = scmp.lt.s32.totalorder %s451_s25, %s451_s25 }
  0x16   :  { %v27_v3 = vadd.s32 128, %v26_v2  ;;  %v28_v4 = vadd.s32 256, %v26_v2  ;;  %v29_v5 = vadd.s32 384, %v26_v2  ;;  %v30_v6 = vadd.s32 512, %v26_v2  ;;  %p493_p8 = scmp.ne.s32.totalorder %s451_s25, %s492_s26  ;;  %p498_p10 = scmp.lt.s32.totalorder %s492_s26, %s492_s26 }
  0x17   :  { %v31_v7 = vadd.s32 640, %v26_v2  ;;  %v32_v8 = vadd.s32 768, %v26_v2  ;;  %v33_v9 = vadd.s32 896, %v26_v2  ;;  %v37_v10 = vmul.u32 1024, %v548_v1 }
  0x18   :  { %p499_p11 = por %p498_p10, %p497_p9 }
  0x19   :  { %v556_v14 = vadd.s32 %v37_v10, %v26_v2  ;;  %v558_v15 = vadd.s32 %v37_v10, %v27_v3  ;;  %v560_v16 = vadd.s32 %v37_v10, %v28_v4  ;;  %v562_v17 = vadd.s32 %v37_v10, %v29_v5 }
  0x1a   :  { %v567_v18 = vadd.s32 %v37_v10, %v30_v6  ;;  %v569_v19 = vadd.s32 %v37_v10, %v31_v7  ;;  %v571_v20 = vadd.s32 %v37_v10, %v32_v8  ;;  %v573_v21 = vadd.s32 %v37_v10, %v33_v9  ;;  %p500_p12 = pnand %p499_p11, %p493_p8 }
  0x1b   :  { %v47_v22 = vmul.u32 2654435761, %v556_v14  ;;  %v48_v23 = vmul.u32 2654435761, %v558_v15 }
  0x1c   :  { %v49_v24 = vmul.u32 2654435761, %v560_v16  ;;  %v50_v25 = vmul.u32 2654435761, %v562_v17 }
  0x1d   :  { %v51_v28 = vmul.u32 2654435761, %v567_v18  ;;  %v52_v29 = vmul.u32 2654435761, %v569_v19  ;;  %v56_v30 = vadd.s32 %v55_v11, %v47_v22  ;;  %v57_v31 = vadd.s32 %v55_v11, %v48_v23 }
  0x1e   :  { %v53_v32 = vmul.u32 2654435761, %v571_v20  ;;  %v54_v33 = vmul.u32 2654435761, %v573_v21  ;;  %v58_v34 = vadd.s32 %v55_v11, %v49_v24  ;;  %v59_v35 = vadd.s32 %v55_v11, %v50_v25 }
  0x1f   :  { %v60_v36 = vadd.s32 %v55_v11, %v51_v28  ;;  %v61_v37 = vadd.s32 %v55_v11, %v52_v29  ;;  %v64_v38 = vshrl.u32 %v56_v30, 16  ;;  %v65_v39 = vshrl.u32 %v57_v31, 16 }
  0x20   :  { %v62_v40 = vadd.s32 %v55_v11, %v53_v32  ;;  %v63_v41 = vadd.s32 %v55_v11, %v54_v33  ;;  %v66_v42 = vshrl.u32 %v58_v34, 16  ;;  %v67_v43 = vshrl.u32 %v59_v35, 16 }
  0x21   :  { %v68_v44 = vshrl.u32 %v60_v36, 16  ;;  %v69_v45 = vshrl.u32 %v61_v37, 16  ;;  %v72_v46 = vxor.u32 %v64_v38, %v56_v30  ;;  %v73_v47 = vxor.u32 %v65_v39, %v57_v31 }
  0x22   :  { %v70_v48 = vshrl.u32 %v62_v40, 16  ;;  %v71_v49 = vshrl.u32 %v63_v41, 16  ;;  %v74_v50 = vxor.u32 %v66_v42, %v58_v34  ;;  %v75_v51 = vxor.u32 %v67_v43, %v59_v35 }
  0x23   :  { %v76_v52 = vxor.u32 %v68_v44, %v60_v36  ;;  %v77_v53 = vxor.u32 %v69_v45, %v61_v37  ;;  %v80_v54 = vmul.u32 2246822507, %v72_v46  ;;  %v81_v55 = vmul.u32 2246822507, %v73_v47 }
  0x24   :  { %v78_v56 = vxor.u32 %v70_v48, %v62_v40  ;;  %v79_v57 = vxor.u32 %v71_v49, %v63_v41  ;;  %v82_v58 = vmul.u32 2246822507, %v74_v50  ;;  %v83_v59 = vmul.u32 2246822507, %v75_v51 }
  0x25   :  { %v84_v60 = vmul.u32 2246822507, %v76_v52  ;;  %v85_v61 = vmul.u32 2246822507, %v77_v53  ;;  %v88_v62 = vshrl.u32 %v80_v54, 13  ;;  %v89_v63 = vshrl.u32 %v81_v55, 13 }
  0x26   :  { %v86_v0 = vmul.u32 2246822507, %v78_v56  ;;  %v87_v2 = vmul.u32 2246822507, %v79_v57  ;;  %v90_v3 = vshrl.u32 %v82_v58, 13  ;;  %v91_v4 = vshrl.u32 %v83_v59, 13 }
  0x27   :  { %v92_v5 = vshrl.u32 %v84_v60, 13  ;;  %v93_v6 = vshrl.u32 %v85_v61, 13  ;;  %v96_v7 = vxor.u32 %v88_v62, %v80_v54  ;;  %v97_v8 = vxor.u32 %v89_v63, %v81_v55 }
  0x28   :  { %v94_v9 = vshrl.u32 %v86_v0, 13  ;;  %v95_v10 = vshrl.u32 %v87_v2, 13  ;;  %v98_v11 = vxor.u32 %v90_v3, %v82_v58  ;;  %v99_v12 = vxor.u32 %v91_v4, %v83_v59 }
  0x29   :  { %v100_v22 = vxor.u32 %v92_v5, %v84_v60  ;;  %v101_v23 = vxor.u32 %v93_v6, %v85_v61  ;;  %v104_v24 = vmul.u32 3266489909, %v96_v7  ;;  %v105_v25 = vmul.u32 3266489909, %v97_v8 }
  0x2a   :  { %v102_v28 = vxor.u32 %v94_v9, %v86_v0  ;;  %v103_v29 = vxor.u32 %v95_v10, %v87_v2  ;;  %v106_v30 = vmul.u32 3266489909, %v98_v11  ;;  %v107_v31 = vmul.u32 3266489909, %v99_v12 }
  0x2b   :  { %v108_v32 = vmul.u32 3266489909, %v100_v22  ;;  %v109_v33 = vmul.u32 3266489909, %v101_v23  ;;  %v112_v34 = vshrl.u32 %v104_v24, 16  ;;  %v113_v35 = vshrl.u32 %v105_v25, 16 }
  0x2c   :  { %v110_v36 = vmul.u32 3266489909, %v102_v28  ;;  %v111_v37 = vmul.u32 3266489909, %v103_v29  ;;  %v114_v38 = vshrl.u32 %v106_v30, 16  ;;  %v115_v39 = vshrl.u32 %v107_v31, 16 }
  0x2d   :  { %v116_v40 = vshrl.u32 %v108_v32, 16  ;;  %v117_v41 = vshrl.u32 %v109_v33, 16  ;;  %v586_v42 = vxor.u32 %v112_v34, %v104_v24  ;;  %v588_v43 = vxor.u32 %v113_v35, %v105_v25 }
  0x2e   :  { %v118_v44 = vshrl.u32 %v110_v36, 16  ;;  %v119_v45 = vshrl.u32 %v111_v37, 16  ;;  %v590_v46 = vxor.u32 %v114_v38, %v106_v30  ;;  %v592_v47 = vxor.u32 %v115_v39, %v107_v31 }
  0x2f   :  { %v594_v48 = vxor.u32 %v116_v40, %v108_v32  ;;  %v596_v49 = vxor.u32 %v117_v41, %v109_v33  ;;  %v128_v50 = vmul.u32 2246822519, %v556_v14  ;;  %v129_v51 = vmul.u32 2246822519, %v558_v15 }
  0x30   :  { %v600_v52 = vxor.u32 %v118_v44, %v110_v36  ;;  %v602_v53 = vxor.u32 %v119_v45, %v111_v37  ;;  %v130_v54 = vmul.u32 2246822519, %v560_v16  ;;  %v131_v55 = vmul.u32 2246822519, %v562_v17 }
  0x31   :  { %v132_v56 = vmul.u32 2246822519, %v567_v18  ;;  %v133_v57 = vmul.u32 2246822519, %v569_v19  ;;  %v138_v58 = vadd.s32 %v579_v26, %v128_v50  ;;  %v139_v59 = vadd.s32 %v579_v26, %v129_v51 }
  0x32   :  { %v134_v14 = vmul.u32 2246822519, %v571_v20  ;;  %v135_v15 = vmul.u32 2246822519, %v573_v21  ;;  %v140_v60 = vadd.s32 %v579_v26, %v130_v54  ;;  %v141_v61 = vadd.s32 %v579_v26, %v131_v55 }
  0x33   :  { %v142_v16 = vadd.s32 %v579_v26, %v132_v56  ;;  %v143_v17 = vadd.s32 %v579_v26, %v133_v57  ;;  %v146_v62 = vshrl.u32 %v138_v58, 16  ;;  %v147_v18 = vshrl.u32 %v139_v59, 16 }
  0x34   :  { %v144_v19 = vadd.s32 %v579_v26, %v134_v14  ;;  %v145_v63 = vadd.s32 %v579_v26, %v135_v15  ;;  %v148_v0 = vshrl.u32 %v140_v60, 16  ;;  %v149_v2 = vshrl.u32 %v141_v61, 16 }
  0x35   :  { %v150_v3 = vshrl.u32 %v142_v16, 16  ;;  %v151_v20 = vshrl.u32 %v143_v17, 16  ;;  %v154_v4 = vxor.u32 %v146_v62, %v138_v58  ;;  %v155_v21 = vxor.u32 %v147_v18, %v139_v59 }
  0x36   :  { %v152_v5 = vshrl.u32 %v144_v19, 16  ;;  %v153_v6 = vshrl.u32 %v145_v63, 16  ;;  %v156_v7 = vxor.u32 %v148_v0, %v140_v60  ;;  %v157_v8 = vxor.u32 %v149_v2, %v141_v61 }
  0x37   :  { %v158_v9 = vxor.u32 %v150_v3, %v142_v16  ;;  %v159_v10 = vxor.u32 %v151_v20, %v143_v17  ;;  %v162_v11 = vmul.u32 2246822507, %v154_v4  ;;  %v163_v12 = vmul.u32 2246822507, %v155_v21 }
  0x38   :  { %v160_v22 = vxor.u32 %v152_v5, %v144_v19  ;;  %v161_v23 = vxor.u32 %v153_v6, %v145_v63  ;;  %v164_v24 = vmul.u32 2246822507, %v156_v7  ;;  %v165_v25 = vmul.u32 2246822507, %v157_v8 }
  0x39   :  { %v166_v28 = vmul.u32 2246822507, %v158_v9  ;;  %v167_v26 = vmul.u32 2246822507, %v159_v10  ;;  %v170_v29 = vshrl.u32 %v162_v11, 13  ;;  %v171_v30 = vshrl.u32 %v163_v12, 13 }
  0x3a   :  { %v168_v31 = vmul.u32 2246822507, %v160_v22  ;;  %v169_v32 = vmul.u32 2246822507, %v161_v23  ;;  %v172_v33 = vshrl.u32 %v164_v24, 13  ;;  %v173_v34 = vshrl.u32 %v165_v25, 13 }
  0x3b   :  { %v174_v35 = vshrl.u32 %v166_v28, 13  ;;  %v175_v36 = vshrl.u32 %v167_v26, 13  ;;  %v178_v37 = vxor.u32 %v170_v29, %v162_v11  ;;  %v179_v38 = vxor.u32 %v171_v30, %v163_v12 }
  0x3c   :  { %v176_v39 = vshrl.u32 %v168_v31, 13  ;;  %v177_v40 = vshrl.u32 %v169_v32, 13  ;;  %v180_v41 = vxor.u32 %v172_v33, %v164_v24  ;;  %v181_v44 = vxor.u32 %v173_v34, %v165_v25 }
  0x3d   :  { %v182_v45 = vxor.u32 %v174_v35, %v166_v28  ;;  %v183_v50 = vxor.u32 %v175_v36, %v167_v26  ;;  %v186_v51 = vmul.u32 3266489909, %v178_v37  ;;  %v187_v54 = vmul.u32 3266489909, %v179_v38 }
  0x3e   :  { %v184_v55 = vxor.u32 %v176_v39, %v168_v31  ;;  %v185_v56 = vxor.u32 %v177_v40, %v169_v32  ;;  %v188_v57 = vmul.u32 3266489909, %v180_v41  ;;  %v189_v58 = vmul.u32 3266489909, %v181_v44 }
  0x3f   :  { %v190_v59 = vmul.u32 3266489909, %v182_v45  ;;  %v191_v14 = vmul.u32 3266489909, %v183_v50  ;;  %v194_v15 = vshrl.u32 %v186_v51, 16  ;;  %v195_v60 = vshrl.u32 %v187_v54, 16 }
  0x40   :  { %v192_v61 = vmul.u32 3266489909, %v184_v55  ;;  %v193_v16 = vmul.u32 3266489909, %v185_v56  ;;  %v196_v17 = vshrl.u32 %v188_v57, 16  ;;  %v197_v62 = vshrl.u32 %v189_v58, 16 }
  0x41   :  { %v198_v18 = vshrl.u32 %v190_v59, 16  ;;  %v199_v19 = vshrl.u32 %v191_v14, 16  ;;  %v618_v63 = vxor.u32 %v194_v15, %v186_v51  ;;  %v620_v0 = vxor.u32 %v195_v60, %v187_v54 }
  0x42   :  { %v200_v2 = vshrl.u32 %v192_v61, 16  ;;  %v201_v3 = vshrl.u32 %v193_v16, 16  ;;  %v622_v20 = vxor.u32 %v196_v17, %v188_v57  ;;  %v624_v4 = vxor.u32 %v197_v62, %v189_v58 }
  0x43   :  { %v626_v21 = vxor.u32 %v198_v18, %v190_v59  ;;  %v628_v5 = vxor.u32 %v199_v19, %v191_v14  ;;  %v210_v6 = vand.u32 255, %v586_v42  ;;  %v211_v7 = vand.u32 255, %v588_v43 }
  0x44   :  { %v632_v8 = vxor.u32 %v200_v2, %v192_v61  ;;  %v634_v9 = vxor.u32 %v201_v3, %v193_v16  ;;  %v212_v10 = vand.u32 255, %v590_v46  ;;  %v213_v11 = vand.u32 255, %v592_v47 }
  0x45   :  { %v214_v12 = vand.u32 255, %v594_v48  ;;  %v215_v22 = vand.u32 255, %v596_v49  ;;  %v216_v23 = vand.u32 255, %v600_v52  ;;  %v217_v24 = vand.u32 255, %v602_v53 }
  0x46   :  { %v218_v25 = vshrl.u32 %v586_v42, 8  ;;  %v219_v28 = vshrl.u32 %v588_v43, 8  ;;  %v220_v26 = vshrl.u32 %v590_v46, 8  ;;  %v221_v29 = vshrl.u32 %v592_v47, 8 }
  0x47   :  { %v222_v30 = vshrl.u32 %v594_v48, 8  ;;  %v223_v31 = vshrl.u32 %v596_v49, 8  ;;  %v224_v32 = vshrl.u32 %v600_v52, 8  ;;  %v225_v33 = vshrl.u32 %v602_v53, 8 }
  0x48   :  { %v226_v34 = vand.u32 255, %v218_v25  ;;  %v227_v35 = vand.u32 255, %v219_v28  ;;  %v228_v36 = vand.u32 255, %v220_v26  ;;  %v229_v37 = vand.u32 255, %v221_v29 }
  0x49   :  { %v230_v38 = vand.u32 255, %v222_v30  ;;  %v231_v39 = vand.u32 255, %v223_v31  ;;  %v232_v40 = vand.u32 255, %v224_v32  ;;  %v233_v41 = vand.u32 255, %v225_v33 }
  0x4a   :  { %v234_v44 = vshrl.u32 %v586_v42, 16  ;;  %v235_v45 = vshrl.u32 %v588_v43, 16  ;;  %v236_v50 = vshrl.u32 %v590_v46, 16  ;;  %v237_v51 = vshrl.u32 %v592_v47, 16 }
  0x4b   :  { %v238_v54 = vshrl.u32 %v594_v48, 16  ;;  %v239_v55 = vshrl.u32 %v596_v49, 16  ;;  %v240_v56 = vshrl.u32 %v600_v52, 16  ;;  %v241_v57 = vshrl.u32 %v602_v53, 16 }
  0x4c   :  { %v242_v58 = vand.u32 255, %v234_v44  ;;  %v243_v59 = vand.u32 255, %v235_v45  ;;  %v244_v14 = vand.u32 255, %v236_v50  ;;  %v245_v15 = vand.u32 255, %v237_v51 }
  0x4d   :  { %v246_v60 = vand.u32 255, %v238_v54  ;;  %v247_v61 = vand.u32 255, %v239_v55  ;;  %v248_v16 = vand.u32 255, %v240_v56  ;;  %v249_v17 = vand.u32 255, %v241_v57 }
  0x4e   :  { %v250_v62 = vshrl.u32 %v586_v42, 24  ;;  %v251_v18 = vshrl.u32 %v588_v43, 24  ;;  %v252_v19 = vshrl.u32 %v590_v46, 24  ;;  %v253_v2 = vshrl.u32 %v592_v47, 24 }
  0x4f   :  { %v254_v3 = vshrl.u32 %v594_v48, 24  ;;  %v255_v25 = vshrl.u32 %v596_v49, 24  ;;  %v256_v28 = vshrl.u32 %v600_v52, 24  ;;  %v257_v26 = vshrl.u32 %v602_v53, 24 }
  0x50   :  { %v258_v29 = vadd.s32 %v226_v34, %v210_v6  ;;  %v259_v30 = vadd.s32 %v227_v35, %v211_v7  ;;  %v260_v31 = vadd.s32 %v228_v36, %v212_v10  ;;  %v261_v32 = vadd.s32 %v229_v37, %v213_v11 }
  0x51   :  { %v262_v33 = vadd.s32 %v230_v38, %v214_v12  ;;  %v263_v42 = vadd.s32 %v231_v39, %v215_v22  ;;  %v264_v44 = vadd.s32 %v232_v40, %v216_v23  ;;  %v265_v43 = vadd.s32 %v233_v41, %v217_v24 }
  0x52   :  { %v266_v45 = vadd.s32 %v258_v29, %v242_v58  ;;  %v267_v46 = vadd.s32 %v259_v30, %v243_v59  ;;  %v268_v50 = vadd.s32 %v260_v31, %v244_v14  ;;  %v269_v47 = vadd.s32 %v261_v32, %v245_v15 }
  0x53   :  { %v270_v51 = vadd.s32 %v262_v33, %v246_v60  ;;  %v271_v48 = vadd.s32 %v263_v42, %v247_v61  ;;  %v272_v54 = vadd.s32 %v264_v44, %v248_v16  ;;  %v273_v49 = vadd.s32 %v265_v43, %v249_v17 }
  0x54   :  { %v666_v55 = vadd.s32 %v266_v45, %v250_v62  ;;  %v668_v52 = vadd.s32 %v267_v46, %v251_v18  ;;  %v670_v53 = vadd.s32 %v268_v50, %v252_v19  ;;  %v672_v6 = vadd.s32 %v269_v47, %v253_v2 }
  0x55   :  { %v674_v7 = vadd.s32 %v270_v51, %v254_v3  ;;  %v676_v10 = vadd.s32 %v271_v48, %v255_v25  ;;  %v678_v11 = vadd.s32 %v272_v54, %v256_v28  ;;  %v680_v12 = vadd.s32 %v273_v49, %v257_v26 }
  0x56   :  { %v282_v22 = vcvt.s32.f32 %v666_v55  ;;  %v283_v23 = vcvt.s32.f32 %v668_v52  ;;  %v290_v39 = vand.u32 255, %v618_v63  ;;  %v291_v40 = vand.u32 255, %v620_v0 }
  0x57   :  { %v292_v41 = vand.u32 255, %v622_v20  ;;  %v293_v56 = vand.u32 255, %v624_v4  ;;  %v294_v57 = vand.u32 255, %v626_v21  ;;  %v295_v58 = vand.u32 255, %v628_v5 }
  0x58   :  { %v296_v59 = vand.u32 255, %v632_v8  ;;  %v297_v14 = vand.u32 255, %v634_v9  ;;  %v298_v15 = vshrl.u32 %v618_v63, 8  ;;  %v299_v60 = vshrl.u32 %v620_v0, 8 }
  0x59   :  { %v300_v61 = vshrl.u32 %v622_v20, 8  ;;  %v301_v16 = vshrl.u32 %v624_v4, 8  ;;  %v302_v17 = vshrl.u32 %v626_v21, 8  ;;  %v303_v62 = vshrl.u32 %v628_v5, 8 }
  0x5a   :  { %v304_v18 = vshrl.u32 %v632_v8, 8  ;;  %v305_v19 = vshrl.u32 %v634_v9, 8  ;;  %v306_v2 = vand.u32 255, %v298_v15  ;;  %v307_v3 = vand.u32 255, %v299_v60 }
  0x5b   :  { %v308_v25 = vand.u32 255, %v300_v61  ;;  %v309_v28 = vand.u32 255, %v301_v16  ;;  %v310_v26 = vand.u32 255, %v302_v17  ;;  %v311_v29 = vand.u32 255, %v303_v62 }
  0x5c   :  { %v312_v30 = vand.u32 255, %v304_v18  ;;  %v313_v31 = vand.u32 255, %v305_v19  ;;  %v314_v32 = vshrl.u32 %v618_v63, 16  ;;  %v315_v33 = vshrl.u32 %v620_v0, 16 }
  0x5d   :  { %v316_v42 = vshrl.u32 %v622_v20, 16  ;;  %v317_v44 = vshrl.u32 %v624_v4, 16  ;;  %v318_v43 = vshrl.u32 %v626_v21, 16  ;;  %v319_v45 = vshrl.u32 %v628_v5, 16 }
  0x5e   :  { %v320_v46 = vshrl.u32 %v632_v8, 16  ;;  %v321_v50 = vshrl.u32 %v634_v9, 16  ;;  %v322_v47 = vand.u32 255, %v314_v32  ;;  %v323_v51 = vand.u32 255, %v315_v33 }
  0x5f   :  { %v324_v48 = vand.u32 255, %v316_v42  ;;  %v325_v54 = vand.u32 255, %v317_v44  ;;  %v326_v49 = vand.u32 255, %v318_v43  ;;  %v327_v15 = vand.u32 255, %v319_v45 }
  0x60   :  { %v328_v60 = vand.u32 255, %v320_v46  ;;  %v329_v61 = vand.u32 255, %v321_v50  ;;  %v330_v16 = vshrl.u32 %v618_v63, 24  ;;  %v331_v17 = vshrl.u32 %v620_v0, 24 }
  0x61   :  { %v332_v62 = vshrl.u32 %v622_v20, 24  ;;  %v333_v18 = vshrl.u32 %v624_v4, 24  ;;  %v334_v19 = vshrl.u32 %v626_v21, 24  ;;  %v335_v27 = vshrl.u32 %v628_v5, 24 }
  0x62   :  { %v336_v32 = vshrl.u32 %v632_v8, 24  ;;  %v337_v33 = vshrl.u32 %v634_v9, 24  ;;  %v338_v42 = vadd.s32 %v306_v2, %v290_v39  ;;  %v339_v44 = vadd.s32 %v307_v3, %v291_v40 }
  0x63   :  { %v340_v43 = vadd.s32 %v308_v25, %v292_v41  ;;  %v341_v45 = vadd.s32 %v309_v28, %v293_v56  ;;  %v342_v46 = vadd.s32 %v310_v26, %v294_v57  ;;  %v343_v63 = vadd.s32 %v311_v29, %v295_v58 }
  0x64   :  { %v344_v50 = vadd.s32 %v312_v30, %v296_v59  ;;  %v345_v0 = vadd.s32 %v313_v31, %v297_v14  ;;  %v346_v38 = vadd.s32 %v338_v42, %v322_v47  ;;  %v347_v20 = vadd.s32 %v339_v44, %v323_v51 }
  0x65   :  { %v348_v37 = vadd.s32 %v340_v43, %v324_v48  ;;  %v349_v4 = vadd.s32 %v341_v45, %v325_v54  ;;  %v350_v36 = vadd.s32 %v342_v46, %v326_v49  ;;  %v351_v21 = vadd.s32 %v343_v63, %v327_v15  ;;  %v394_v45 = vld [vmem:[#allocation4] sm:$0xff]  ;;  %v395_v63 = vld [vmem:[#allocation4 + $0x8] sm:$0xff] }
  0x66   :  { %v352_v35 = vadd.s32 %v344_v50, %v328_v60  ;;  %v353_v5 = vadd.s32 %v345_v0, %v329_v61  ;;  %v354_v34 = vadd.s32 %v346_v38, %v330_v16  ;;  %v355_v8 = vadd.s32 %v347_v20, %v331_v17 }
  0x67   :  { %v356_v24 = vadd.s32 %v348_v37, %v332_v62  ;;  %v357_v9 = vadd.s32 %v349_v4, %v333_v18  ;;  %v358_v39 = vadd.s32 %v350_v36, %v334_v19  ;;  %v359_v40 = vadd.s32 %v351_v21, %v335_v27 }
  0x68   :  { %v360_v41 = vadd.s32 %v352_v35, %v336_v32  ;;  %v361_v56 = vadd.s32 %v353_v5, %v337_v33  ;;  %v362_v57 = vcvt.s32.f32 %v354_v34  ;;  %v363_v58 = vcvt.s32.f32 %v355_v8 }
  0x69   :  { %v364_v59 = vcvt.s32.f32 %v356_v24  ;;  %v365_v14 = vcvt.s32.f32 %v357_v9  ;;  %v366_v2 = vcvt.s32.f32 %v358_v39  ;;  %v367_v3 = vcvt.s32.f32 %v359_v40 }
  0x6a   :  { %v368_v25 = vcvt.s32.f32 %v360_v41  ;;  %v369_v28 = vcvt.s32.f32 %v361_v56  ;;  %v370_v26 = vadd.f32 %v362_v57, %v282_v22  ;;  %v371_v38 = vadd.f32 %v363_v58, %v283_v23 }
  0x6b   :  { %v756_v37 = vcvt.s32.f32 %v670_v53  ;;  %v757_v27 = vcvt.s32.f32 %v672_v6  ;;  %v758_v34 = vcvt.s32.f32 %v674_v7  ;;  %v759_v29 = vcvt.s32.f32 %v676_v10 }
  0x6c   :  { %v760_v31 = vcvt.s32.f32 %v678_v11  ;;  %v761_v55 = vcvt.s32.f32 %v680_v12  ;;  %v459_v52 = vadd.f32 -1020.0, %v370_v26  ;;  %v460_v23 = vadd.f32 -1020.0, %v371_v38 }
  0x6d   :  { %v372_v36 = vadd.f32 %v364_v59, %v756_v37  ;;  %v373_v35 = vadd.f32 %v365_v14, %v757_v27  ;;  %v374_v24 = vadd.f32 %v366_v2, %v758_v34  ;;  %v375_v30 = vadd.f32 %v367_v3, %v759_v29 }
  0x6e   :  { %v376_v47 = vadd.f32 %v368_v25, %v760_v31  ;;  %v377_v22 = vadd.f32 %v369_v28, %v761_v55  ;;  %v386_v15 = vmul.f32 0.00047841962, %v459_v52  ;;  %v387_v7 = vmul.f32 0.00047841962, %v460_v23 }
  0x6f   :  { %v461_v51 = vadd.f32 -1020.0, %v372_v36  ;;  %v462_v53 = vadd.f32 -1020.0, %v373_v35  ;;  %v463_v48 = vadd.f32 -1020.0, %v374_v24  ;;  %v464_v54 = vadd.f32 -1020.0, %v375_v30 }
  0x70   :  { %v465_v6 = vadd.f32 -1020.0, %v376_v47  ;;  %v466_v49 = vadd.f32 -1020.0, %v377_v22  ;;  %v762_v10 = vunpack.c.0.s8 %v554_v13  ;;  %v404_v18 = vcombine.low %v386_v15, %v387_v7 }
  0x71   :  { %v388_v60 = vmul.f32 0.00047841962, %v461_v51  ;;  %v389_v11 = vmul.f32 0.00047841962, %v462_v53  ;;  %v390_v16 = vmul.f32 0.00047841962, %v463_v48 }
  0x72   :  { %v411_v61 = vsub.s32 %v762_v10, %v548_v1  ;;  %v391_v17 = vmul.f32 0.00047841962, %v464_v54  ;;  %v392_v12 = vmul.f32 0.00047841962, %v465_v6  ;;  %v393_v62 = vmul.f32 0.00047841962, %v466_v49 }
  0x73   :  { %v405_v19 = vcombine.low %v388_v60, %v389_v11 }
  0x74   :  { %v421_v32 = vcombine.low %v390_v16, %v391_v17  ;;  %v412_v33 = vrot.slane %v404_v18, %v411_v61  ;;  %v422_v42 = vcombine.low %v392_v12, %v393_v62 }
  0x75   :  { %v419_v44 = vrot.slane %v405_v19, %v411_v61 }
  0x76   :  { %v429_v43 = vrot.slane %v421_v32, %v411_v61  ;;  %v436_v46 = vrot.slane %v422_v42, %v411_v61 }
  0x77   :  { %v420_v50 = vcombine.low %v412_v33, %v419_v44 }
  0x78   :  { %v437_v13 = vcombine.low %v429_v43, %v436_v46 }
  0x79   :  { %v440_v1 = vadd.f32 %v420_v50, %v394_v45 }
  0x7a   :  { %v441_v0 = vadd.f32 %v437_v13, %v395_v63 }
  0x7b   :  { %442 = vst [vmem:[#allocation7] sm:$0xff] %v440_v1 }
  0x7c   :  { %443 = vst [vmem:[#allocation7 + $0x8] sm:$0xff] %v441_v0 }
  0x7d   :  { %503 = shalt.err (!%p500_p12)
}
  0x7e   :  { %s504_s29 = scalar_lea.hbm %s755_s2, 256 }
  0x7f   :  { %p505_p13 = scmp.ne.s32.totalorder %s755_s2, %s504_s29  ;;  %p508_p0 = scmp.lt.u32.totalorder %s504_s29, %s755_s2 }
  0x81   :  { %p510_p1 = pnand %p508_p0, %p505_p13 }
  0x83   :  { %513 = shalt.err (!%p510_p1)
}
  0x84   :  { %453 = dma.vmem_to_hbm [thread:$0]  %s451_s25, 256, %s755_s2, [#allocation6]  }
  0x85   :  { %516 = dma.done.wait [#allocation6], 256  }
  0x86   :  { %517 = vsyncadd [#allocation6], 4294967040 }
  0x87   :  { %457 = vsyncpa [#allocation5], 1 }
  0x88   :  { %458 = vsyncpa [#allocation6], 1 }

</bundles_post_ra>
